<compile_context>
chip_gen: v5e
topology: v5e:2x2
jax: 0.10.0
libtpu: 0.0.40
codegen_flags: <defaults>
</compile_context>

<pallas_src>
import functools

import jax
import jax.numpy as jnp
from jax import lax
from jax.experimental import pallas as pl
from jax.experimental.pallas import tpu as pltpu


def _round_up(x, m):
    return (x + m - 1) // m * m


def _convblock_kernel(x_ref, w_ref, b_ref, alpha_ref, o_ref, *, cout, kw, tj):
    """Fused direct conv + bias + PReLU for one (image, flat-column tile).

    x_ref:     (kh*Cin, tj + 128)  dh-stacked, row-slot-flattened input tile
                                   (its kw-1 lane halo is already included).
    w_ref:     (kw*Cout, kh*Cin)   conv weight, dw-major rows.
    b_ref:     (Cout, 1)           bias column.
    alpha_ref: (1,) in SMEM        PReLU slope (num_parameters=1).
    o_ref:     (Cout, tj)          lane-dense output tile.
    """
    # dw = 0 dot with the bias folded into the accumulator initialization.
    acc = b_ref[...] + jnp.dot(w_ref[0:cout, :], x_ref[:, 0:tj],
                               preferred_element_type=jnp.float32)
    for dw in range(1, kw):
        # Static (dw < 128) lane shift of the resident tile -> XLU work only.
        acc = acc + jnp.dot(w_ref[dw * cout:(dw + 1) * cout, :],
                            x_ref[:, dw:dw + tj],
                            preferred_element_type=jnp.float32)
    alpha = alpha_ref[0]
    o_ref[...] = jnp.where(acc > 0.0, acc, alpha * acc).astype(o_ref.dtype)


@functools.partial(jax.jit,
                   static_argnames=("kernel_size", "padding", "tile_cols"))
def conv_block_forward(x, weight, bias, prelu_alpha, *, kernel_size=3,
                       padding=1, tile_cols=2048):
    """ConvBlock forward: PReLU(Conv2d(x)), stride=1, symmetric padding.

    x:           (N, Cin, H, W) float32
    weight:      (Cout, Cin, kh, kw) float32
    bias:        (Cout,) float32
    prelu_alpha: scalar float32 (PyTorch PReLU default num_parameters=1)
    returns:     (N, Cout, Hout, Wout) float32
    """
    n, cin, h, w = x.shape
    cout = weight.shape[0]
    kh = kw = kernel_size
    hp, wp = h + 2 * padding, w + 2 * padding
    h_out = hp - kh + 1
    w_out = wp - kw + 1

    # Row-slot layout: padded row r lives at flat lane columns [r*wl, r*wl+wp);
    # output pixel (ho, wo) lives at flat column ho*wl + wo and conv tap
    # (dh, dw) is the constant flat shift dh*wl + dw.
    wl = _round_up(wp, 128)
    halo = 128                      # covers kw-1 < 128, keeps tiles 128-aligned
    k0 = kh * cin

    # Whole output rows per tile; guard the f32 (Cout, tj) accumulator against
    # vreg spills (<= ~16 vregs) and respect the requested lane budget.
    max_rows_vreg = max(1, (16 * 1024) // (cout * wl))
    max_rows_cols = max(1, tile_cols // wl)
    rows_per_tile = max(1, min(h_out, max_rows_cols, max_rows_vreg))
    tj = rows_per_tile * wl
    num_j = pl.cdiv(h_out, rows_per_tile)
    h_out_p = num_j * rows_per_tile

    # Zero-pad spatially, place each padded row in its lane slot, flatten, and
    # zero-pad the tail so every tile-slot slice below stays in bounds.
    xp = jnp.pad(x, ((0, 0), (0, 0), (padding, padding), (padding, padding)))
    xslot = jnp.pad(xp, ((0, 0), (0, 0), (0, 0), (0, wl - wp)))
    x_flat = xslot.reshape(n, cin, hp * wl)
    l_src = num_j * tj + (kh - 1) * wl + halo
    x_flat = jnp.pad(x_flat, ((0, 0), (0, 0), (0, l_src - hp * wl)))

    # Pre-stack the kh dh-shifted row copies on the channel axis and bake each
    # tile's lane halo into its own contiguous slot, so the kernel BlockSpec
    # is a plain non-overlapping blocked window (fully pipelined by Pallas).
    # TODO(synk): for very large num_j build this with one strided copy
    # instead of a trace-time python loop over tiles.
    tile_w = tj + halo
    tiles = []
    for j in range(num_j):
        chans = [lax.slice_in_dim(x_flat, j * tj + dh * wl,
                                  j * tj + dh * wl + tile_w, axis=2)
                 for dh in range(kh)]
        tiles.append(jnp.concatenate(chans, axis=1))       # (n, k0, tile_w)
    x_tiled = jnp.concatenate(tiles, axis=2) if num_j > 1 else tiles[0]

    # Weight, dw-major rows: row dw*Cout + co, col dh*Cin + ci.
    w_stack = jnp.transpose(weight, (3, 0, 2, 1)).reshape(kw * cout, k0)
    w_stack = w_stack.astype(jnp.float32)
    b_col = bias.reshape(cout, 1).astype(jnp.float32)
    alpha = jnp.reshape(prelu_alpha, (1,)).astype(jnp.float32)

    kernel = functools.partial(_convblock_kernel, cout=cout, kw=kw, tj=tj)

    flops = 2 * n * num_j * tj * cout * k0 * kw
    bytes_accessed = 4 * (x_tiled.size + w_stack.size + b_col.size
                          + n * cout * num_j * tj)
    # Double-buffered input + output blocks per grid step, plus resident
    # weights/bias; headroom x4, capped below physical VMEM on all chips.
    step_bytes = 4 * (2 * k0 * tile_w + 2 * cout * tj
                      + w_stack.size + b_col.size)
    vmem_limit = int(min(96 * 2 ** 20, max(32 * 2 ** 20, 4 * step_bytes)))

    out_flat = pl.pallas_call(
        kernel,
        out_shape=jax.ShapeDtypeStruct((n, cout, num_j * tj), jnp.float32),
        grid=(n, num_j),
        in_specs=[
            # Per-tile input slot (with halo), pipelined by the BlockSpec.
            pl.BlockSpec((None, k0, tile_w), lambda i, j: (i, 0, j)),
            # Weight / bias: tiny, resident across the whole grid.
            pl.BlockSpec((kw * cout, k0), lambda i, j: (0, 0)),
            pl.BlockSpec((cout, 1), lambda i, j: (0, 0)),
            # PReLU slope: scalar path.
            pl.BlockSpec(memory_space=pltpu.MemorySpace.SMEM),
        ],
        out_specs=pl.BlockSpec((None, cout, tj), lambda i, j: (i, 0, j)),
        compiler_params=pltpu.CompilerParams(
            dimension_semantics=("parallel", "parallel"),
            vmem_limit_bytes=vmem_limit),
        cost_estimate=pl.CostEstimate(flops=flops, transcendentals=0,
                                      bytes_accessed=bytes_accessed),
    )(x_tiled, w_stack, b_col, alpha)

    # Contiguous (free) reshape to the row-slot 4-D layout; the only remaining
    # post-op is a single crop. A fused consumer would read the padded
    # (n, cout, h_out, wl) layout directly and skip this copy entirely.
    out = out_flat.reshape(n, cout, h_out_p, wl)
    return out[:, :, :h_out, :w_out]


def _reference(x, weight, bias, prelu_alpha, padding):
    y = lax.conv_general_dilated(
        x, weight, window_strides=(1, 1),
        padding=((padding, padding), (padding, padding)),
        dimension_numbers=("NCHW", "OIHW", "NCHW"))
    y = y + bias.reshape(1, -1, 1, 1)
    return jnp.where(y > 0, y, prelu_alpha * y)


if __name__ == "__main__":
    key = jax.random.PRNGKey(0)
    k_x, k_w, k_b = jax.random.split(key, 3)

    # ConvBlock(in_channels=4, out_channels=8, kernel_size=3, padding=1)
    N, CIN, H, W = 2, 4, 16, 16
    COUT, KSZ, PAD = 8, 3, 1

    x = jax.random.normal(k_x, (N, CIN, H, W), dtype=jnp.float32)
    weight = 0.1 * jax.random.normal(k_w, (COUT, CIN, KSZ, KSZ),
                                     dtype=jnp.float32)
    bias = 0.1 * jax.random.normal(k_b, (COUT,), dtype=jnp.float32)
    prelu_alpha = jnp.float32(0.25)  # PyTorch PReLU default init

    out = conv_block_forward(x, weight, bias, prelu_alpha,
                             kernel_size=KSZ, padding=PAD)
    out = jax.block_until_ready(out)

    ref = _reference(x, weight, bias, prelu_alpha, PAD)
    assert out.shape == (N, COUT, H, W)
    assert jnp.allclose(out, ref, atol=1e-4, rtol=1e-4)

    print("KERNEL_OK")
</pallas_src>

<mosaic_0001>
module attributes {stable_mosaic.version = 11 : i64} {
  func.func @_convblock_kernel(%arg0: i32, %arg1: i32, %arg2: memref<1x12x2176xf32, #tpu.memory_space<vmem>>, %arg3: memref<24x12xf32, #tpu.memory_space<vmem>>, %arg4: memref<8x1xf32, #tpu.memory_space<vmem>>, %arg5: memref<1xf32, #tpu.memory_space<smem>>, %arg6: memref<1x8x2048xf32, #tpu.memory_space<vmem>>) attributes {dimension_semantics = [#tpu.dimension_semantics<parallel>, #tpu.dimension_semantics<parallel>], iteration_bounds = array<i64: 2, 1>, scalar_prefetch = 0 : i64, scratch_operands = 0 : i64, tpu.core_type = #tpu.core_type<tc>, window_params = [{transform_indices = @transform_0, window_bounds = array<i64: 1, 12, 2176>}, {pipeline_mode = #tpu.pipeline_mode<synchronous>, transform_indices = @transform_1, window_bounds = array<i64: 24, 12>}, {pipeline_mode = #tpu.pipeline_mode<synchronous>, transform_indices = @transform_2, window_bounds = array<i64: 8, 1>}, {transform_indices = @transform_3, window_bounds = array<i64: 1>}, {transform_indices = @transform_4, window_bounds = array<i64: 1, 8, 2048>}]} {
    %c0 = arith.constant 0 : index
    %c0_0 = arith.constant 0 : index
    %0 = vector.load %arg4[%c0, %c0_0] : memref<8x1xf32, #tpu.memory_space<vmem>>, vector<8x1xf32>
    %c0_1 = arith.constant 0 : index
    %c0_2 = arith.constant 0 : index
    %1 = vector.load %arg3[%c0_1, %c0_2] : memref<24x12xf32, #tpu.memory_space<vmem>>, vector<8x12xf32>
    %c0_3 = arith.constant 0 : index
    %c0_4 = arith.constant 0 : index
    %c0_5 = arith.constant 0 : index
    %2 = vector.load %arg2[%c0_3, %c0_4, %c0_5] : memref<1x12x2176xf32, #tpu.memory_space<vmem>>, vector<1x12x2048xf32>
    %3 = vector.shape_cast %2 : vector<1x12x2048xf32> to vector<12x2048xf32>
    %cst = arith.constant dense<0.000000e+00> : vector<8x2048xf32>
    %4 = tpu.matmul %1, %3, %cst {dimension_numbers = #tpu.dot_dimension_numbers<[1], [0], [0], [1], [0, 0, 1, 1], [], []>} : vector<8x12xf32>, vector<12x2048xf32>, vector<8x2048xf32> -> vector<8x2048xf32>
    %5 = vector.broadcast %0 : vector<8x1xf32> to vector<8x2048xf32>
    %6 = arith.addf %5, %4 : vector<8x2048xf32>
    %c8 = arith.constant 8 : index
    %c0_6 = arith.constant 0 : index
    %7 = vector.load %arg3[%c8, %c0_6] : memref<24x12xf32, #tpu.memory_space<vmem>>, vector<8x12xf32>
    %c0_7 = arith.constant 0 : index
    %c0_8 = arith.constant 0 : index
    %c1 = arith.constant 1 : index
    %8 = vector.load %arg2[%c0_7, %c0_8, %c1] : memref<1x12x2176xf32, #tpu.memory_space<vmem>>, vector<1x12x2048xf32>
    %9 = vector.shape_cast %8 : vector<1x12x2048xf32> to vector<12x2048xf32>
    %cst_9 = arith.constant dense<0.000000e+00> : vector<8x2048xf32>
    %10 = tpu.matmul %7, %9, %cst_9 {dimension_numbers = #tpu.dot_dimension_numbers<[1], [0], [0], [1], [0, 0, 1, 1], [], []>} : vector<8x12xf32>, vector<12x2048xf32>, vector<8x2048xf32> -> vector<8x2048xf32>
    %11 = arith.addf %6, %10 : vector<8x2048xf32>
    %c16 = arith.constant 16 : index
    %c0_10 = arith.constant 0 : index
    %12 = vector.load %arg3[%c16, %c0_10] : memref<24x12xf32, #tpu.memory_space<vmem>>, vector<8x12xf32>
    %c0_11 = arith.constant 0 : index
    %c0_12 = arith.constant 0 : index
    %c2 = arith.constant 2 : index
    %13 = vector.load %arg2[%c0_11, %c0_12, %c2] : memref<1x12x2176xf32, #tpu.memory_space<vmem>>, vector<1x12x2048xf32>
    %14 = vector.shape_cast %13 : vector<1x12x2048xf32> to vector<12x2048xf32>
    %cst_13 = arith.constant dense<0.000000e+00> : vector<8x2048xf32>
    %15 = tpu.matmul %12, %14, %cst_13 {dimension_numbers = #tpu.dot_dimension_numbers<[1], [0], [0], [1], [0, 0, 1, 1], [], []>} : vector<8x12xf32>, vector<12x2048xf32>, vector<8x2048xf32> -> vector<8x2048xf32>
    %16 = arith.addf %11, %15 : vector<8x2048xf32>
    %c0_14 = arith.constant 0 : index
    %17 = memref.load %arg5[%c0_14] : memref<1xf32, #tpu.memory_space<smem>>
    %cst_15 = arith.constant 0.000000e+00 : f32
    %18 = vector.broadcast %cst_15 : f32 to vector<8x2048xf32>
    %19 = arith.cmpf ogt, %16, %18 : vector<8x2048xf32>
    %20 = vector.broadcast %17 : f32 to vector<8x2048xf32>
    %21 = arith.mulf %20, %16 : vector<8x2048xf32>
    %22 = arith.select %19, %16, %21 : vector<8x2048xi1>, vector<8x2048xf32>
    %c0_16 = arith.constant 0 : index
    %c0_17 = arith.constant 0 : index
    %c0_18 = arith.constant 0 : index
    %23 = vector.load %arg6[%c0_16, %c0_17, %c0_18] : memref<1x8x2048xf32, #tpu.memory_space<vmem>>, vector<1x8x2048xf32>
    %24 = vector.shape_cast %23 : vector<1x8x2048xf32> to vector<8x2048xf32>
    %25 = vector.shape_cast %22 : vector<8x2048xf32> to vector<1x8x2048xf32>
    tpu.vector_store %arg6[%c0_16, %c0_17, %c0_18], %25 {strides = array<i32>} : memref<1x8x2048xf32, #tpu.memory_space<vmem>>, vector<1x8x2048xf32>,
    return
  }
  func.func @transform_0(%arg0: i32, %arg1: i32) -> (i32, i32, i32) {
    %c0_i32 = arith.constant 0 : i32
    %c0_i32_0 = arith.constant 0 : i32
    return %arg0, %c0_i32, %arg1 : i32, i32, i32
  }
  func.func @transform_1(%arg0: i32, %arg1: i32) -> (i32, i32) {
    %c0_i32 = arith.constant 0 : i32
    %c0_i32_0 = arith.constant 0 : i32
    %c0_i32_1 = arith.constant 0 : i32
    return %c0_i32, %c0_i32_0 : i32, i32
  }
  func.func @transform_2(%arg0: i32, %arg1: i32) -> (i32, i32) {
    %c0_i32 = arith.constant 0 : i32
    %c0_i32_0 = arith.constant 0 : i32
    %c0_i32_1 = arith.constant 0 : i32
    return %c0_i32, %c0_i32_0 : i32, i32
  }
  func.func @transform_3(%arg0: i32, %arg1: i32) -> i32 {
    %c0_i32 = arith.constant 0 : i32
    %c0_i32_0 = arith.constant 0 : i32
    return %c0_i32 : i32
  }
  func.func @transform_4(%arg0: i32, %arg1: i32) -> (i32, i32, i32) {
    %c0_i32 = arith.constant 0 : i32
    %c0_i32_0 = arith.constant 0 : i32
    return %arg0, %c0_i32, %arg1 : i32, i32, i32
  }
}

</mosaic_0001>

<bundles_post_ra>
// kernel: conv_block_forward.1
= control target key start
LH: loop header
LB: loop body
LE: loop exit
PB: predicated region body
PF: predicated region fallthrough
CT: control target
= control target key end

     0   :  { %s2137_s17 = smov 0   ;;  %s2139_s18 = smov 0   ;;  %s2815_s0 = inlined_call_operand.vmem [shape: f32[2,12,2176], index: 0, kind: input, shape index: {}]   ;;  %s2816_s1 = inlined_call_operand.vmem [shape: f32[24,12], index: 1, kind: input, shape index: {}]   ;;  %s2817_s2 = inlined_call_operand.vmem [shape: f32[8,1], index: 2, kind: input, shape index: {}]   ;;  %s2818_s3 = inlined_call_operand.<no memory space> [shape: f32[1], index: 3, kind: input, shape index: {}]   ;;  %s2819_s4 = inlined_call_operand.vmem [shape: f32[2,8,2048], index: 4, kind: output, shape index: {}]  }
   0x1   :  { %9 = sst [smem:[#allocation2]] %s2818_s3  ;;  %s2141_s19 = smov 0  }
   0x2 LB: > { %s27_s3 = sadd.s32 1, %s2100_s18  ;;  %p1869_p0 = scmp.ge.s32.totalorder %s2104_s19, 1  ;;  %s2104_s19 = sphi %s2141_s19, %s15_s19   ;;  %s2100_s18 = sphi %s2139_s18, %s2821_s18   ;;  %s2096_s17 = sphi %s2137_s17, %s2820_s17  }
   0x3   : > { %p29_p1 = scmp.ge.s32.totalorder %s27_s3, 2  ;;  %p184_p2 = scmp.lt.s32.totalorder %s2104_s19, 3 }
   0x5   : > { %s2823_s3 = smov (%p29_p1, %s27_s3), 0  ;;  %p185_p3 = pnand %p1869_p0, %p184_p2 }
   0x6   : > { %p219_p4 = scmp.lt.s32.totalorder (!%p185_p3), %s2096_s17, 1  ;;  %s2106_s24 = smov (!%p185_p3), 127  }
   0x7   : > { %188 = sbr.rel (%p185_p3) target bundleno = 405 (0x195), region = 36  ;;  %s2107_s25 = smov (!%p185_p3), 126  }
   0x8   : > { %s1712_s8 = sld [smem:[#allocation2]] (!%p185_p3) }
   0xc   : > { %s2825_s17 = smov (!%p219_p4, %s2096_s17), 1  ;;  %vm276_vm0 = vcmask 1043456   ;;  %v2359_v44 = vld [vmem:[%s2816_s1] sm:$0xff]  ;;  %vm272_vm1 = vcmask 97280   ;;  %vm803_vm2 = vcmask 1039360   ;;  %vm1292_vm3 = vcmask 1031168  }
   0xd   : > { %s1972_s20 = smul.u32 272, %s2825_s17  ;;  %s1971_s9 = sshll.u32 %s2825_s17, 7 }
   0xe   : > { %s2740_s12 = scalar_lea.vmem %s2819_s4, %s1971_s9 }
   0xf   : > { %s2161_s23 = scalar_lea.vmem %s2815_s0, %s1972_s20 }
  0x10   : > { %v2164_v0 = vld [vmem:[%s2161_s23 + $0xa8] sm:$0xf]  ;;  %v2167_v1 = vld [vmem:[%s2161_s23 + $0x98] sm:$0xf]  ;;  %v2170_v2 = vld [vmem:[%s2161_s23] sm:$0xff] }
  0x11   : > { %777 = vrot.lane.b32.xlu1 %v2164_v0, %s2106_s24  ;;  %773 = vrot.lane.b32.xlu0 %v2167_v1, %s2106_s24  ;;  %v2177_v3 = vld [vmem:[%s2161_s23 + $0x20] sm:$0xff]  ;;  %v2184_v5 = vld [vmem:[%s2161_s23 + $0x10] sm:$0xff] }
  0x12   : > { %v2181_v4 = vpack.i.bf16 %v2170_v2, %v2177_v3  ;;  %v2187_v6 = vld [vmem:[%s2161_s23 + $0x18] sm:$0xff]  ;;  %v687_v8 = vld [vmem:[%s2161_s23 + $0xa0] sm:$0xf]  ;;  %v2200_v9 = vld [vmem:[%s2161_s23 + $0x88] sm:$0xf] }
  0x13   : > { %v2193_v7 = vpack.i.bf16 %v2187_v6, %v2184_v5  ;;  %v2203_v10 = vld [vmem:[%s2161_s23 + $0x8] sm:$0xff]  ;;  %v2206_v11 = vld [vmem:[%s2161_s23 + $0x30] sm:$0xff]  ;;  %v2222_v14 = vld [vmem:[%s2161_s23 + $0xb8] sm:$0xf] }
  0x14   : > { %2006 = vrot.lane.b32.xlu2 %v2181_v4, %s2106_s24  ;;  %v2212_v12 = vpack.i.bf16 %v2206_v11, %v2203_v10  ;;  %v2215_v13 = vld [vmem:[%s2161_s23 + $0x90] sm:$0xf]  ;;  %v2227_v15 = vld [vmem:[%s2161_s23 + $0x38] sm:$0xff]  ;;  %v2230_v16 = vld [vmem:[%s2161_s23 + $0x40] sm:$0xff] }
  0x15   : > { %v2233_v17 = vld [vmem:[%s2161_s23 + $0xc0] sm:$0xf]  ;;  %v2236_v18 = vld [vmem:[%s2161_s23 + $0xc8] sm:$0xf]  ;;  %v2240_v19 = vpack.i.bf16 %v2230_v16, %v2227_v15  ;;  %v2250_v21 = vld [vmem:[%s2161_s23 + $0x50] sm:$0xff] }
  0x16   : > { %v2247_v20 = vld [vmem:[%s2161_s23 + $0x28] sm:$0xff]  ;;  %v2259_v23 = vld [vmem:[%s2161_s23 + $0xb0] sm:$0xf]  ;;  %v2266_v24 = vld [vmem:[%s2161_s23 + $0xd8] sm:$0xf] }
  0x17   : > { %v2256_v22 = vpack.i.bf16 %v2250_v21, %v2247_v20  ;;  %v2271_v25 = vld [vmem:[%s2161_s23 + $0x58] sm:$0xff]  ;;  %v2274_v26 = vld [vmem:[%s2161_s23 + $0x60] sm:$0xff]  ;;  %v2280_v28 = vld [vmem:[%s2161_s23 + $0xe8] sm:$0xf] }
  0x18   : > { %v2277_v27 = vld [vmem:[%s2161_s23 + $0xe0] sm:$0xf]  ;;  %v2284_v29 = vpack.i.bf16 %v2274_v26, %v2271_v25  ;;  %v2291_v30 = vld [vmem:[%s2161_s23 + $0x48] sm:$0xff]  ;;  %v2294_v31 = vld [vmem:[%s2161_s23 + $0x70] sm:$0xff] }
  0x19   : > { %775 = vrot.lane.b32.xlu0 %v687_v8, %s2106_s24  ;;  %2001 = vrot.lane.b32.xlu1 %v2193_v7, %s2106_s24  ;;  %v2300_v32 = vpack.i.bf16 %v2294_v31, %v2291_v30  ;;  %v2303_v33 = vld [vmem:[%s2161_s23 + $0xd0] sm:$0xf]  ;;  %v2310_v34 = vld [vmem:[%s2161_s23 + $0xf8] sm:$0xf] }
  0x1a   : > { %v2315_v35 = vld [vmem:[%s2161_s23 + $0x78] sm:$0xff]  ;;  %v683_v36 = vld [vmem:[%s2161_s23 + $0x80] sm:$0xff]  ;;  %v2322_v38 = vld [vmem:[%s2161_s23 + $0x108] sm:$0xf] }
  0x1b   : > { %v2319_v37 = vld [vmem:[%s2161_s23 + $0x100] sm:$0xf]  ;;  %v2325_v39 = vpack.i.bf16 %v683_v36, %v2315_v35  ;;  %v2334_v40 = vld [vmem:[%s2161_s23 + $0xf0] sm:$0xf]  ;;  %v2337_v41 = vld [vmem:[%s2161_s23 + $0x68] sm:$0xff] }
  0x1c   : > { %769 = vrot.lane.b32.xlu2 %v2200_v9, %s2106_s24  ;;  %v258_v42 = vld [vmem:[%s2161_s23 + $0x98] sm:$0xf]  ;;  %v259_v43 = vld [vmem:[%s2161_s23 + $0xa0] sm:$0xf]  ;;  %v256_v45 = vld [vmem:[%s2161_s23 + $0x88] sm:$0xf] }
  0x1d   : > { %1877 = vmatpush.msk.msra.mxu2 %vm276_vm0, %v258_v42  ;;  %1879 = vmatpush.msk.msra.mxu3 %vm276_vm0, %v259_v43  ;;  %v257_v46 = vld [vmem:[%s2161_s23 + $0x90] sm:$0xf]  ;;  %v262_v47 = vld [vmem:[%s2161_s23 + $0xb8] sm:$0xf]  ;;  %v263_v48 = vld [vmem:[%s2161_s23 + $0xc0] sm:$0xf] }
  0x1e   : > { %1873 = vmatpush.msk.msra.mxu0 %vm276_vm0, %v256_v45  ;;  %1875 = vmatpush.msk.msra.mxu1 %vm276_vm0, %v257_v46  ;;  %v266_v49 = vld [vmem:[%s2161_s23 + $0xd8] sm:$0xf]  ;;  %v267_v50 = vld [vmem:[%s2161_s23 + $0xe0] sm:$0xf]  ;;  %v260_v51 = vld [vmem:[%s2161_s23 + $0xa8] sm:$0xf] }
  0x1f   : > { %380 = vmatpush.msra.mxu2 %v2184_v5  ;;  %400 = vmatpush.msra.mxu3 %v2187_v6  ;;  %v261_v52 = vld [vmem:[%s2161_s23 + $0xb0] sm:$0xf]  ;;  %v270_v53 = vld [vmem:[%s2161_s23 + $0xf8] sm:$0xf]  ;;  %v271_v54 = vld [vmem:[%s2161_s23 + $0x100] sm:$0xf] }
  0x20   : > { %1878 = vmatmul.msk.f32.vlgmr.msra.gmra.mxu2 %vm272_vm1, %v2359_v44  ;;  %1880 = vmatmul.msk.f32.vlgmr.msra.gmra.mxu3 %vm272_vm1, %v2359_v44  ;;  %v264_v56 = vld [vmem:[%s2161_s23 + $0xc8] sm:$0xf]  ;;  %v265_v57 = vld [vmem:[%s2161_s23 + $0xd0] sm:$0xf] }
  0x21   : > { %771 = vrot.lane.b32.xlu0 %v2215_v13, %s2106_s24  ;;  %2011 = vrot.lane.b32.xlu1 %v2212_v12, %s2106_s24  ;;  %v268_v58 = vld [vmem:[%s2161_s23 + $0xe8] sm:$0xf]  ;;  %v269_v59 = vld [vmem:[%s2161_s23 + $0xf0] sm:$0xf] }
  0x22   : > { %1885 = vmatpush.msk.msrb.mxu2 %vm276_vm0, %v262_v47  ;;  %1887 = vmatpush.msk.msrb.mxu3 %vm276_vm0, %v263_v48 }
  0x23   : > { %340 = vmatpush.msra.mxu0 %v2170_v2  ;;  %360 = vmatpush.msra.mxu1 %v2203_v10 }
  0x24   : > { %781 = vrot.lane.b32.xlu2 %v2222_v14, %s2106_s24  ;;  %460 = vmatpush.msrb.mxu2 %v2206_v11 }
  0x25   : > { %480 = vmatpush.msrb.mxu3 %v2227_v15  ;;  %1874 = vmatmul.msk.f32.vlgmr.msra.gmra.mxu0 %vm272_vm1, %v2359_v44 }
  0x26   : > { %1876 = vmatmul.msk.f32.vlgmr.msra.gmra.mxu1 %vm272_vm1, %v2359_v44  ;;  %1893 = vmatpush.msk.msra.mxu2 %vm276_vm0, %v266_v49 }
  0x27   : > { %1895 = vmatpush.msk.msra.mxu3 %vm276_vm0, %v267_v50  ;;  %1881 = vmatpush.msk.msrb.mxu0 %vm276_vm0, %v260_v51 }
  0x28   : > { %1886 = vmatmul.msk.f32.vlgmr.msrb.gmra.mxu2 %vm272_vm1, %v2359_v44  ;;  %1888 = vmatmul.msk.f32.vlgmr.msrb.gmra.mxu3 %vm272_vm1, %v2359_v44 }
  0x29   : > { %783 = vrot.lane.b32.xlu0 %v2233_v17, %s2106_s24  ;;  %785 = vrot.lane.b32.xlu1 %v2236_v18, %s2106_s24 }
  0x2a   : > { %540 = vmatpush.msra.mxu2 %v2250_v21  ;;  %1883 = vmatpush.msk.msrb.mxu1 %vm276_vm0, %v261_v52 }
  0x2b   : > { %560 = vmatpush.msra.mxu3 %v2271_v25  ;;  %420 = vmatpush.msrb.mxu0 %v2177_v3 }
  0x2c   : > { %2016 = vrot.lane.b32.xlu2 %v2240_v19, %s2106_s24  ;;  %1901 = vmatpush.msk.msrb.mxu2 %vm276_vm0, %v270_v53 }
  0x2d   : > { %1903 = vmatpush.msk.msrb.mxu3 %vm276_vm0, %v271_v54  ;;  %440 = vmatpush.msrb.mxu1 %v2247_v20 }
  0x2e   : > { %620 = vmatpush.msrb.mxu2 %v2294_v31  ;;  %1882 = vmatmul.msk.f32.vlgmr.msrb.gmra.mxu0 %vm272_vm1, %v2359_v44  ;;  %v2108_v31 = vmov 0  }
  0x2f   : > { %640 = vmatpush.msrb.mxu3 %v2315_v35  ;;  %1884 = vmatmul.msk.f32.vlgmr.msrb.gmra.mxu1 %vm272_vm1, %v2359_v44 }
  0x30   : > { %1894 = vmatmul.msk.f32.vlgmr.msra.gmra.mxu2 %vm272_vm1, %v2359_v44  ;;  %1896 = vmatmul.msk.f32.vlgmr.msra.gmra.mxu3 %vm272_vm1, %v2359_v44 }
  0x31   : > { %779 = vrot.lane.b32.xlu0 %v2259_v23, %s2106_s24  ;;  %2021 = vrot.lane.b32.xlu1 %v2256_v22, %s2106_s24 }
  0x32   : > { %1889 = vmatpush.msk.msra.mxu0 %vm276_vm0, %v264_v56  ;;  %1891 = vmatpush.msk.msra.mxu1 %vm276_vm0, %v265_v57 }
  0x33   : > { %2080 = vset.pattern.permute.xlu1 %v2108_v31  ;;  %2081 = vset.pattern.permute.xlu0 %v2108_v31 }
  0x34   : > { %789 = vrot.lane.b32.xlu2 %v2266_v24, %s2106_s24  ;;  %500 = vmatpush.msra.mxu0 %v2230_v16 }
  0x35   : > { %520 = vmatpush.msra.mxu1 %v2291_v30 }
  0x36   : > { %1897 = vmatpush.msk.msrb.mxu0 %vm276_vm0, %v268_v58 }
  0x37   : > { %1899 = vmatpush.msk.msrb.mxu1 %vm276_vm0, %v269_v59  ;;  %1890 = vmatmul.msk.f32.vlgmr.msra.gmra.mxu0 %vm272_vm1, %v2359_v44 }
  0x38   : > { %580 = vmatpush.msrb.mxu0 %v2274_v26  ;;  %1892 = vmatmul.msk.f32.vlgmr.msra.gmra.mxu1 %vm272_vm1, %v2359_v44 }
  0x39   : > { %791 = vrot.lane.b32.xlu0 %v2277_v27, %s2106_s24  ;;  %793 = vrot.lane.b32.xlu1 %v2280_v28, %s2106_s24 }
  0x3a   : > { %600 = vmatpush.msrb.mxu1 %v2337_v41  ;;  %1902 = vmatmul.msk.f32.vlgmr.msrb.gmra.mxu2 %vm272_vm1, %v2359_v44 }
  0x3b   : > { %1904 = vmatmul.msk.f32.vlgmr.msrb.gmra.mxu3 %vm272_vm1, %v2359_v44 }
  0x3c   : > { %2026 = vrot.lane.b32.xlu2 %v2284_v29, %s2106_s24 }
  0x3f   : > { %1898 = vmatmul.msk.f32.vlgmr.msrb.gmra.mxu0 %vm272_vm1, %v2359_v44 }
  0x40   : > { %1900 = vmatmul.msk.f32.vlgmr.msrb.gmra.mxu1 %vm272_vm1, %v2359_v44 }
  0x41   : > { %787 = vrot.lane.b32.xlu0 %v2303_v33, %s2106_s24  ;;  %2031 = vrot.lane.b32.xlu1 %v2300_v32, %s2106_s24 }
  0x44   : > { %797 = vrot.lane.b32.xlu2 %v2310_v34, %s2106_s24 }
  0x49   : > { %799 = vrot.lane.b32.xlu0 %v2319_v37, %s2106_s24  ;;  %801 = vrot.lane.b32.xlu1 %v2322_v38, %s2106_s24 }
  0x4c   : > { %2036 = vrot.lane.b32.xlu2 %v2325_v39, %s2106_s24 }
  0x51   : > { %795 = vrot.lane.b32.xlu0 %v2334_v40, %s2106_s24  ;;  %761 = vrot.lane.b32.xlu1 %v2337_v41, %s2106_s24 }
  0x54   : > { %1262 = vrot.lane.b32.xlu2 %v2167_v1, %s2107_s25 }
  0x59   : > { %1264 = vrot.lane.b32.xlu0 %v687_v8, %s2107_s25  ;;  %1266 = vrot.lane.b32.xlu1 %v2164_v0, %s2107_s25  ;;  %v2488_v8 = vld [vmem:[%s2816_s1 + $0x8] sm:$0xff] }
  0x5c   : > { %2041 = vrot.lane.b32.xlu2 %v2193_v7, %s2107_s25 }
  0x61   : > { %1258 = vrot.lane.b32.xlu1 %v2200_v9, %s2107_s25  ;;  %2046 = vrot.lane.b32.xlu0 %v2181_v4, %s2107_s25 }
  0x64   : > { %1260 = vrot.lane.b32.xlu2 %v2215_v13, %s2107_s25 }
  0x69   : > { %1270 = vrot.lane.b32.xlu1 %v2222_v14, %s2107_s25  ;;  %2051 = vrot.lane.b32.xlu0 %v2212_v12, %s2107_s25 }
  0x6c   : > { %1272 = vrot.lane.b32.xlu2 %v2233_v17, %s2107_s25 }
  0x6e   : > { %v2411_v55 = vpop.permute.xlu2 %2006 }
  0x6f   : > { %v2008_v1 = vunpack.i.l.bf16 %v2411_v55  ;;  %v2009_v14 = vunpack.i.h.bf16 %v2411_v55 }
  0x71   : > { %2056 = vrot.lane.b32.xlu1 %v2240_v19, %s2107_s25  ;;  %1274 = vrot.lane.b32.xlu0 %v2236_v18, %s2107_s25 }
  0x74   : > { %1268 = vrot.lane.b32.xlu2 %v2259_v23, %s2107_s25 }
  0x76   : > { %v770_v60 = vpop.permute.xlu2 %769 }
  0x79   : > { %1278 = vrot.lane.b32.xlu1 %v2266_v24, %s2107_s25  ;;  %2061 = vrot.lane.b32.xlu0 %v2256_v22, %s2107_s25 }
  0x7c   : > { %1280 = vrot.lane.b32.xlu2 %v2277_v27, %s2107_s25 }
  0x7e   : > { %v2457_v61 = vpop.permute.xlu2 %781 }
  0x81   : > { %2066 = vrot.lane.b32.xlu1 %v2284_v29, %s2107_s25  ;;  %1282 = vrot.lane.b32.xlu0 %v2280_v28, %s2107_s25 }
  0x83   : > { %v2467_v62 = vpop.permute.xlu1 %777  ;;  %v774_v63 = vpop.permute.xlu0 %773 }
  0x84   : > { %1276 = vrot.lane.b32.xlu2 %v2303_v33, %s2107_s25 }
  0x86   : > { %v2471_v0 = vpop.permute.xlu2 %2016 }
  0x87   : > { %v2019_v21 = vunpack.i.h.bf16 %v2471_v0  ;;  %v2018_v22 = vunpack.i.l.bf16 %v2471_v0 }
  0x89   : > { %1286 = vrot.lane.b32.xlu1 %v2310_v34, %s2107_s25  ;;  %2071 = vrot.lane.b32.xlu0 %v2300_v32, %s2107_s25  ;;  %v811_v28 = vsel %vm803_vm2, %v2018_v22, %v2019_v21  ;;  %v238_v32 = vld [vmem:[%s2817_s2] sm:$0xff] }
  0x8b   : > { %v776_v2 = vpop.permute.xlu0 %775  ;;  %v2002_v3 = vpop.permute.xlu1 %2001 }
  0x8c   : > { %v822_v4 = vsel %vm803_vm2, %v774_v63, %v776_v2  ;;  %v823_v5 = vsel %vm803_vm2, %v776_v2, %v2467_v62  ;;  %v2004_v6 = vunpack.i.h.bf16 %v2002_v3  ;;  %v2003_v7 = vunpack.i.l.bf16 %v2002_v3  ;;  %1288 = vrot.lane.b32.xlu2 %v2319_v37, %s2107_s25 }
  0x8d   : > { %1909 = vmatpush.msk.msra.mxu2 %vm276_vm0, %v822_v4  ;;  %1911 = vmatpush.msk.msra.mxu3 %vm276_vm0, %v823_v5 }
  0x8e   : > { %v2490_v9 = vpop.permute.xlu2 %789  ;;  %v807_v10 = vsel %vm803_vm2, %v2004_v6, %v2008_v1  ;;  %v806_v11 = vsel %vm803_vm2, %v2003_v7, %v2004_v6 }
  0x8f   : > { %962 = vmatpush.msra.mxu3 %v807_v10  ;;  %942 = vmatpush.msra.mxu2 %v806_v11 }
  0x90   : > { %1910 = vmatmul.msk.f32.vlgmr.msra.gmra.mxu2 %vm272_vm1, %v2488_v8  ;;  %1912 = vmatmul.msk.f32.vlgmr.msra.gmra.mxu3 %vm272_vm1, %v2488_v8 }
  0x91   : > { %2076 = vrot.lane.b32.xlu1 %v2325_v39, %s2107_s25  ;;  %1290 = vrot.lane.b32.xlu0 %v2322_v38, %s2107_s25 }
  0x93   : > { %v772_v12 = vpop.permute.xlu0 %771  ;;  %v2012_v13 = vpop.permute.xlu1 %2011 }
  0x94   : > { %v820_v15 = vsel %vm803_vm2, %v770_v60, %v772_v12  ;;  %v821_v16 = vsel %vm803_vm2, %v772_v12, %v774_v63  ;;  %v2013_v17 = vunpack.i.l.bf16 %v2012_v13  ;;  %1284 = vrot.lane.b32.xlu2 %v2334_v40, %s2107_s25  ;;  %v2014_v23 = vunpack.i.h.bf16 %v2012_v13 }
  0x95   : > { %1905 = vmatpush.msk.msra.mxu0 %vm276_vm0, %v820_v15  ;;  %1907 = vmatpush.msk.msra.mxu1 %vm276_vm0, %v821_v16 }
  0x96   : > { %v2511_v18 = vpop.permute.xlu2 %2026  ;;  %v804_v19 = vsel %vm803_vm2, %v2009_v14, %v2013_v17  ;;  %v805_v20 = vsel %vm803_vm2, %v2013_v17, %v2003_v7  ;;  %v810_v30 = vsel %vm803_vm2, %v2014_v23, %v2018_v22 }
  0x97   : > { %902 = vmatpush.msra.mxu0 %v804_v19  ;;  %922 = vmatpush.msra.mxu1 %v805_v20  ;;  %v2028_v42 = vunpack.i.l.bf16 %v2511_v18 }
  0x98   : > { %1906 = vmatmul.msk.f32.vlgmr.msra.gmra.mxu0 %vm272_vm1, %v2488_v8  ;;  %1908 = vmatmul.msk.f32.vlgmr.msra.gmra.mxu1 %vm272_vm1, %v2488_v8 }
  0x99   : > { %1250 = vrot.lane.b32.xlu0 %v2337_v41, %s2107_s25  ;;  %647 = vperm.xlu1 %2080, %v238_v32   ;;  %v2029_v41 = vunpack.i.h.bf16 %v2511_v18 }
  0x9b   : > { %v784_v24 = vpop.permute.xlu0 %783  ;;  %v786_v25 = vpop.permute.xlu1 %785  ;;  %v815_v48 = vsel %vm803_vm2, %v2028_v42, %v2029_v41 }
  0x9c   : > { %v826_v26 = vsel %vm803_vm2, %v2457_v61, %v784_v24  ;;  %v827_v27 = vsel %vm803_vm2, %v784_v24, %v786_v25 }
  0x9d   : > { %1917 = vmatpush.msk.msrb.mxu2 %vm276_vm0, %v826_v26  ;;  %1919 = vmatpush.msk.msrb.mxu3 %vm276_vm0, %v827_v27 }
  0x9e   : > { %v2529_v29 = vpop.permute.xlu2 %797 }
  0x9f   : > { %1022 = vmatpush.msrb.mxu2 %v810_v30  ;;  %1042 = vmatpush.msrb.mxu3 %v811_v28 }
  0xa0   : > { %1918 = vmatmul.msk.f32.vlgmr.msrb.gmra.mxu2 %vm272_vm1, %v2488_v8  ;;  %1920 = vmatmul.msk.f32.vlgmr.msrb.gmra.mxu3 %vm272_vm1, %v2488_v8 }
  0xa3   : > { %v780_v33 = vpop.permute.xlu0 %779  ;;  %v2022_v34 = vpop.permute.xlu1 %2021 }
  0xa4   : > { %v824_v35 = vsel %vm803_vm2, %v2467_v62, %v780_v33  ;;  %v825_v36 = vsel %vm803_vm2, %v780_v33, %v2457_v61  ;;  %v2023_v37 = vunpack.i.l.bf16 %v2022_v34  ;;  %v2024_v43 = vunpack.i.h.bf16 %v2022_v34 }
  0xa5   : > { %1913 = vmatpush.msk.msrb.mxu0 %vm276_vm0, %v824_v35  ;;  %1915 = vmatpush.msk.msrb.mxu1 %vm276_vm0, %v825_v36 }
  0xa6   : > { %v2037_v38 = vpop.permute.xlu2 %2036  ;;  %v808_v39 = vsel %vm803_vm2, %v2008_v1, %v2023_v37  ;;  %v809_v40 = vsel %vm803_vm2, %v2023_v37, %v2014_v23  ;;  %v814_v50 = vsel %vm803_vm2, %v2024_v43, %v2028_v42 }
  0xa7   : > { %982 = vmatpush.msrb.mxu0 %v808_v39  ;;  %1002 = vmatpush.msrb.mxu1 %v809_v40  ;;  %v2039_v58 = vunpack.i.h.bf16 %v2037_v38  ;;  %v2038_v60 = vunpack.i.l.bf16 %v2037_v38 }
  0xa8   : > { %1916 = vmatmul.msk.f32.vlgmr.msrb.gmra.mxu1 %vm272_vm1, %v2488_v8  ;;  %1914 = vmatmul.msk.f32.vlgmr.msrb.gmra.mxu0 %vm272_vm1, %v2488_v8 }
  0xa9   : > { %v819_v2 = vsel %vm803_vm2, %v2038_v60, %v2039_v58 }
  0xab   : > { %v792_v44 = vpop.permute.xlu0 %791  ;;  %v794_v45 = vpop.permute.xlu1 %793 }
  0xac   : > { %v830_v46 = vsel %vm803_vm2, %v2490_v9, %v792_v44  ;;  %v831_v47 = vsel %vm803_vm2, %v792_v44, %v794_v45 }
  0xad   : > { %1925 = vmatpush.msk.msra.mxu2 %vm276_vm0, %v830_v46  ;;  %1927 = vmatpush.msk.msra.mxu3 %vm276_vm0, %v831_v47 }
  0xae   : > { %v1263_v49 = vpop.permute.xlu2 %1262 }
  0xaf   : > { %1102 = vmatpush.msra.mxu2 %v814_v50  ;;  %1122 = vmatpush.msra.mxu3 %v815_v48 }
  0xb0   : > { %1926 = vmatmul.msk.f32.vlgmr.msra.gmra.mxu2 %vm272_vm1, %v2488_v8  ;;  %1928 = vmatmul.msk.f32.vlgmr.msra.gmra.mxu3 %vm272_vm1, %v2488_v8 }
  0xb3   : > { %v788_v51 = vpop.permute.xlu0 %787  ;;  %v2032_v52 = vpop.permute.xlu1 %2031 }
  0xb4   : > { %v828_v53 = vsel %vm803_vm2, %v786_v25, %v788_v51  ;;  %v829_v54 = vsel %vm803_vm2, %v788_v51, %v2490_v9  ;;  %v2033_v55 = vunpack.i.l.bf16 %v2032_v52  ;;  %v2034_v61 = vunpack.i.h.bf16 %v2032_v52 }
  0xb5   : > { %1921 = vmatpush.msk.msra.mxu0 %vm276_vm0, %v828_v53  ;;  %1923 = vmatpush.msk.msra.mxu1 %vm276_vm0, %v829_v54 }
  0xb6   : > { %v812_v56 = vsel %vm803_vm2, %v2019_v21, %v2033_v55  ;;  %v813_v57 = vsel %vm803_vm2, %v2033_v55, %v2024_v43  ;;  %v2573_v59 = vpop.permute.xlu2 %2041  ;;  %v818_v3 = vsel %vm803_vm2, %v2034_v61, %v2038_v60  ;;  %v2613_v21 = vld [vmem:[%s2816_s1 + $0x10] sm:$0xff] }
  0xb7   : > { %1062 = vmatpush.msra.mxu0 %v812_v56  ;;  %1082 = vmatpush.msra.mxu1 %v813_v57  ;;  %v2044_v13 = vunpack.i.h.bf16 %v2573_v59  ;;  %v2043_v14 = vunpack.i.l.bf16 %v2573_v59 }
  0xb8   : > { %1924 = vmatmul.msk.f32.vlgmr.msra.gmra.mxu1 %vm272_vm1, %v2488_v8  ;;  %1922 = vmatmul.msk.f32.vlgmr.msra.gmra.mxu0 %vm272_vm1, %v2488_v8 }
  0xb9   : > { %v1295_v20 = vsel %vm1292_vm3, %v2043_v14, %v2044_v13 }
  0xbb   : > { %v800_v62 = vpop.permute.xlu0 %799  ;;  %v802_v63 = vpop.permute.xlu1 %801 }
  0xbc   : > { %v834_v0 = vsel %vm803_vm2, %v2529_v29, %v800_v62  ;;  %v835_v1 = vsel %vm803_vm2, %v800_v62, %v802_v63 }
  0xbd   : > { %1933 = vmatpush.msk.msrb.mxu2 %vm276_vm0, %v834_v0  ;;  %1935 = vmatpush.msk.msrb.mxu3 %vm276_vm0, %v835_v1 }
  0xbe   : > { %v1261_v4 = vpop.permute.xlu2 %1260 }
  0xbf   : > { %1182 = vmatpush.msrb.mxu2 %v818_v3  ;;  %1202 = vmatpush.msrb.mxu3 %v819_v2  ;;  %v1310_v10 = vsel %vm1292_vm3, %v1261_v4, %v1263_v49 }
  0xc0   : > { %1934 = vmatmul.msk.f32.vlgmr.msrb.gmra.mxu2 %vm272_vm1, %v2488_v8  ;;  %1936 = vmatmul.msk.f32.vlgmr.msrb.gmra.mxu3 %vm272_vm1, %v2488_v8 }
  0xc3   : > { %v796_v5 = vpop.permute.xlu0 %795  ;;  %v762_v6 = vpop.permute.xlu1 %761 }
  0xc4   : > { %v832_v7 = vsel %vm803_vm2, %v794_v45, %v796_v5  ;;  %v833_v9 = vsel %vm803_vm2, %v796_v5, %v2529_v29  ;;  %v816_v11 = vsel %vm803_vm2, %v2029_v41, %v762_v6  ;;  %v817_v12 = vsel %vm803_vm2, %v762_v6, %v2034_v61 }
  0xc5   : > { %1929 = vmatpush.msk.msrb.mxu0 %vm276_vm0, %v832_v7  ;;  %1931 = vmatpush.msk.msrb.mxu1 %vm276_vm0, %v833_v9 }
  0xc6   : > { %v1273_v17 = vpop.permute.xlu2 %1272 }
  0xc7   : > { %1142 = vmatpush.msrb.mxu0 %v816_v11  ;;  %1162 = vmatpush.msrb.mxu1 %v817_v12 }
  0xc8   : > { %1930 = vmatmul.msk.f32.vlgmr.msrb.gmra.mxu0 %vm272_vm1, %v2488_v8  ;;  %1932 = vmatmul.msk.f32.vlgmr.msrb.gmra.mxu1 %vm272_vm1, %v2488_v8 }
  0xc9   : > { %1939 = vmatpush.msk.msra.mxu1 %vm276_vm0, %v1310_v10 }
  0xcb   : > { %v1265_v15 = vpop.permute.xlu0 %1264  ;;  %v1267_v16 = vpop.permute.xlu1 %1266 }
  0xcc   : > { %v1311_v18 = vsel %vm1292_vm3, %v1263_v49, %v1265_v15  ;;  %v1312_v19 = vsel %vm1292_vm3, %v1265_v15, %v1267_v16 }
  0xcd   : > { %1941 = vmatpush.msk.msra.mxu2 %vm276_vm0, %v1311_v18  ;;  %1943 = vmatpush.msk.msra.mxu3 %vm276_vm0, %v1312_v19 }
  0xce   : > { %v1269_v25 = vpop.permute.xlu2 %1268 }
  0xcf   : > { %1431 = vmatpush.msra.mxu2 %v1295_v20  ;;  %v1313_v35 = vsel %vm1292_vm3, %v1267_v16, %v1269_v25 }
  0xd0   : > { %1942 = vmatmul.msk.f32.vlgmr.msra.gmra.mxu2 %vm272_vm1, %v2613_v21 }
  0xd3   : > { %v1259_v8 = vpop.permute.xlu1 %1258  ;;  %v2047_v22 = vpop.permute.xlu0 %2046 }
  0xd4   : > { %v1309_v23 = vsel %vm1292_vm3, %v1259_v8, %v1261_v4  ;;  %v2048_v24 = vunpack.i.l.bf16 %v2047_v22  ;;  %v2049_v29 = vunpack.i.h.bf16 %v2047_v22  ;;  %v2664_v4 = vpop.f32.mrf.mxu2  ;;  %v402_v22 = vpop.f32.mrf.mxu3 }
  0xd5   : > { %1937 = vmatpush.msk.msra.mxu0 %vm276_vm0, %v1309_v23  ;;  %v342_v23 = vpop.f32.mrf.mxu0 }
  0xd6   : > { %v1296_v26 = vsel %vm1292_vm3, %v2044_v13, %v2048_v24  ;;  %v1281_v32 = vpop.permute.xlu2 %1280 }
  0xd7   : > { %1451 = vmatpush.msra.mxu3 %v1296_v26 }
  0xd8   : > { %1944 = vmatmul.msk.f32.vlgmr.msra.gmra.mxu3 %vm272_vm1, %v2613_v21 }
  0xdb   : > { %v1271_v27 = vpop.permute.xlu1 %1270  ;;  %v2052_v28 = vpop.permute.xlu0 %2051 }
  0xdc   : > { %v1315_v30 = vsel %vm1292_vm3, %v1271_v27, %v1273_v17  ;;  %v2053_v31 = vunpack.i.l.bf16 %v2052_v28  ;;  %v1314_v36 = vsel %vm1292_vm3, %v1269_v25, %v1271_v27  ;;  %v2054_v39 = vunpack.i.h.bf16 %v2052_v28  ;;  %v2680_v18 = vpop.f32.mrf.mxu2  ;;  %v2694_v26 = vpop.f32.mrf.mxu3 }
  0xdd   : > { %1949 = vmatpush.msk.msrb.mxu2 %vm276_vm0, %v1315_v30  ;;  %v2696_v27 = vpop.f32.mrf.mxu0 }
  0xde   : > { %v1293_v33 = vsel %vm1292_vm3, %v2049_v29, %v2053_v31  ;;  %v1294_v34 = vsel %vm1292_vm3, %v2053_v31, %v2043_v14  ;;  %v1277_v45 = vpop.permute.xlu2 %1276 }
  0xdf   : > { %1391 = vmatpush.msra.mxu0 %v1293_v33  ;;  %1411 = vmatpush.msra.mxu1 %v1294_v34 }
  0xe0   : > { %1938 = vmatmul.msk.f32.vlgmr.msra.gmra.mxu0 %vm272_vm1, %v2613_v21  ;;  %1940 = vmatmul.msk.f32.vlgmr.msra.gmra.mxu1 %vm272_vm1, %v2613_v21 }
  0xe1   : > { %1945 = vmatpush.msk.msrb.mxu0 %vm276_vm0, %v1313_v35  ;;  %1947 = vmatpush.msk.msrb.mxu1 %vm276_vm0, %v1314_v36 }
  0xe3   : > { %v2057_v37 = vpop.permute.xlu1 %2056  ;;  %v1275_v38 = vpop.permute.xlu0 %1274 }
  0xe4   : > { %v2059_v40 = vunpack.i.h.bf16 %v2057_v37  ;;  %v2058_v41 = vunpack.i.l.bf16 %v2057_v37  ;;  %v1316_v42 = vsel %vm1292_vm3, %v1273_v17, %v1275_v38  ;;  %v1317_v52 = vsel %vm1292_vm3, %v1275_v38, %v1277_v45  ;;  %v2692_v25 = vpop.f32.mrf.mxu2  ;;  %v2700_v30 = vpop.f32.mrf.mxu3 }
  0xe5   : > { %1951 = vmatpush.msk.msrb.mxu3 %vm276_vm0, %v1316_v42  ;;  %v2702_v31 = vpop.f32.mrf.mxu0 }
  0xe6   : > { %v1299_v43 = vsel %vm1292_vm3, %v2054_v39, %v2058_v41  ;;  %v1300_v44 = vsel %vm1292_vm3, %v2058_v41, %v2059_v40  ;;  %v1289_v54 = vpop.permute.xlu2 %1288 }
  0xe7   : > { %1511 = vmatpush.msrb.mxu2 %v1299_v43  ;;  %1531 = vmatpush.msrb.mxu3 %v1300_v44 }
  0xe8   : > { %1950 = vmatmul.msk.f32.vlgmr.msrb.gmra.mxu2 %vm272_vm1, %v2613_v21  ;;  %1952 = vmatmul.msk.f32.vlgmr.msrb.gmra.mxu3 %vm272_vm1, %v2613_v21 }
  0xeb   : > { %v1279_v46 = vpop.permute.xlu1 %1278  ;;  %v2062_v47 = vpop.permute.xlu0 %2061 }
  0xec   : > { %v1319_v48 = vsel %vm1292_vm3, %v1279_v46, %v1281_v32  ;;  %v2063_v49 = vunpack.i.l.bf16 %v2062_v47  ;;  %v1318_v53 = vsel %vm1292_vm3, %v1277_v45, %v1279_v46  ;;  %v2064_v57 = vunpack.i.h.bf16 %v2062_v47  ;;  %v622_v29 = vpop.f32.mrf.mxu2  ;;  %v2706_v34 = vpop.f32.mrf.mxu3 }
  0xed   : > { %1957 = vmatpush.msk.msra.mxu2 %vm276_vm0, %v1319_v48 }
  0xee   : > { %v1297_v50 = vsel %vm1292_vm3, %v2048_v24, %v2063_v49  ;;  %v1298_v51 = vsel %vm1292_vm3, %v2063_v49, %v2054_v39  ;;  %v1285_v3 = vpop.permute.xlu2 %1284  ;;  %v362_v24 = vpop.f32.mrf.mxu1 }
  0xef   : > { %1471 = vmatpush.msrb.mxu0 %v1297_v50  ;;  %1491 = vmatpush.msrb.mxu1 %v1298_v51 }
  0xf0   : > { %1946 = vmatmul.msk.f32.vlgmr.msrb.gmra.mxu0 %vm272_vm1, %v2613_v21  ;;  %1948 = vmatmul.msk.f32.vlgmr.msrb.gmra.mxu1 %vm272_vm1, %v2613_v21 }
  0xf1   : > { %1953 = vmatpush.msk.msra.mxu0 %vm276_vm0, %v1317_v52  ;;  %1955 = vmatpush.msk.msra.mxu1 %vm276_vm0, %v1318_v53 }
  0xf3   : > { %v2067_v55 = vpop.permute.xlu1 %2066  ;;  %v1283_v56 = vpop.permute.xlu0 %1282 }
  0xf4   : > { %v2069_v58 = vunpack.i.h.bf16 %v2067_v55  ;;  %v2068_v59 = vunpack.i.l.bf16 %v2067_v55  ;;  %v1320_v60 = vsel %vm1292_vm3, %v1281_v32, %v1283_v56  ;;  %v1321_v7 = vsel %vm1292_vm3, %v1283_v56, %v1285_v3 }
  0xf5   : > { %1959 = vmatpush.msk.msra.mxu3 %vm276_vm0, %v1320_v60  ;;  %v2730_v55 = vstv %s1712_s8 }
  0xf6   : > { %v1303_v61 = vsel %vm1292_vm3, %v2064_v57, %v2068_v59  ;;  %v1304_v62 = vsel %vm1292_vm3, %v2068_v59, %v2069_v58  ;;  %v2698_v28 = vpop.f32.mrf.mxu1 }
  0xf7   : > { %1591 = vmatpush.msra.mxu2 %v1303_v61  ;;  %1611 = vmatpush.msra.mxu3 %v1304_v62 }
  0xf8   : > { %1958 = vmatmul.msk.f32.vlgmr.msra.gmra.mxu2 %vm272_vm1, %v2613_v21  ;;  %1960 = vmatmul.msk.f32.vlgmr.msra.gmra.mxu3 %vm272_vm1, %v2613_v21 }
  0xfb   : > { %v1287_v63 = vpop.permute.xlu1 %1286  ;;  %v2072_v0 = vpop.permute.xlu0 %2071 }
  0xfc   : > { %v1323_v1 = vsel %vm1292_vm3, %v1287_v63, %v1289_v54  ;;  %v2073_v2 = vunpack.i.l.bf16 %v2072_v0  ;;  %v1322_v9 = vsel %vm1292_vm3, %v1285_v3, %v1287_v63  ;;  %v2074_v12 = vunpack.i.h.bf16 %v2072_v0 }
  0xfd   : > { %1965 = vmatpush.msk.msrb.mxu2 %vm276_vm0, %v1323_v1 }
  0xfe   : > { %v1301_v5 = vsel %vm1292_vm3, %v2059_v40, %v2073_v2  ;;  %v1302_v6 = vsel %vm1292_vm3, %v2073_v2, %v2064_v57  ;;  %v2704_v32 = vpop.f32.mrf.mxu1 }
  0xff   : > { %1551 = vmatpush.msra.mxu0 %v1301_v5  ;;  %1571 = vmatpush.msra.mxu1 %v1302_v6 }
 0x100   : > { %1954 = vmatmul.msk.f32.vlgmr.msra.gmra.mxu0 %vm272_vm1, %v2613_v21  ;;  %1956 = vmatmul.msk.f32.vlgmr.msra.gmra.mxu1 %vm272_vm1, %v2613_v21 }
 0x101   : > { %1961 = vmatpush.msk.msrb.mxu0 %vm276_vm0, %v1321_v7  ;;  %1963 = vmatpush.msk.msrb.mxu1 %vm276_vm0, %v1322_v9 }
 0x103   : > { %v2077_v10 = vpop.permute.xlu1 %2076  ;;  %v1291_v11 = vpop.permute.xlu0 %1290 }
 0x104   : > { %v2079_v13 = vunpack.i.h.bf16 %v2077_v10  ;;  %v2078_v14 = vunpack.i.l.bf16 %v2077_v10  ;;  %v1324_v15 = vsel %vm1292_vm3, %v1289_v54, %v1291_v11 }
 0x105   : > { %1967 = vmatpush.msk.msrb.mxu3 %vm276_vm0, %v1324_v15 }
 0x106   : > { %v1307_v16 = vsel %vm1292_vm3, %v2074_v12, %v2078_v14  ;;  %v1308_v17 = vsel %vm1292_vm3, %v2078_v14, %v2079_v13  ;;  %v2710_v35 = vpop.f32.mrf.mxu1 }
 0x107   : > { %1671 = vmatpush.msrb.mxu2 %v1307_v16  ;;  %1691 = vmatpush.msrb.mxu3 %v1308_v17 }
 0x108   : > { %1966 = vmatmul.msk.f32.vlgmr.msrb.gmra.mxu2 %vm272_vm1, %v2613_v21  ;;  %1968 = vmatmul.msk.f32.vlgmr.msrb.gmra.mxu3 %vm272_vm1, %v2613_v21 }
 0x10b   : > { %v1251_v19 = vpop.permute.xlu0 %1250  ;;  %v2714_v41 = vpop.permute.xlu1 %647 }
 0x10c   : > { %v1305_v20 = vsel %vm1292_vm3, %v2069_v58, %v1251_v19  ;;  %v1306_v8 = vsel %vm1292_vm3, %v1251_v19, %v2074_v12  ;;  %v664_v43 = vadd.f32 %v2714_v41, %v622_v29  ;;  %v652_v51 = vadd.f32 %v2714_v41, %v2664_v4 }
 0x10d   : > { %1631 = vmatpush.msrb.mxu0 %v1305_v20  ;;  %1651 = vmatpush.msrb.mxu1 %v1306_v8  ;;  %v653_v59 = vadd.f32 %v2714_v41, %v402_v22  ;;  %v650_v61 = vadd.f32 %v2714_v41, %v342_v23  ;;  %v651_v62 = vadd.f32 %v2714_v41, %v362_v24 }
 0x10e   : > { %1962 = vmatmul.msk.f32.vlgmr.msrb.gmra.mxu0 %vm272_vm1, %v2613_v21  ;;  %1964 = vmatmul.msk.f32.vlgmr.msrb.gmra.mxu1 %vm272_vm1, %v2613_v21  ;;  %v2708_v21 = vpop.f32.mrf.mxu0  ;;  %v656_v16 = vadd.f32 %v2714_v41, %v2680_v18  ;;  %v657_v17 = vadd.f32 %v2714_v41, %v2694_v26  ;;  %v654_v19 = vadd.f32 %v2714_v41, %v2696_v27 }
 0x10f   : > { %v655_v20 = vadd.f32 %v2714_v41, %v2698_v28 }
 0x113   : > { %v944_v33 = vpop.f32.mrf.mxu2  ;;  %v964_v37 = vpop.f32.mrf.mxu3 }
 0x114   : > { %v1209_v52 = vadd.f32 %v944_v33, %v652_v51  ;;  %v1210_v0 = vadd.f32 %v964_v37, %v653_v59  ;;  %v659_v59 = vadd.f32 %v2714_v41, %v2704_v32 }
 0x115   : > { %v924_v39 = vpop.f32.mrf.mxu1 }
 0x116   : > { %v904_v38 = vpop.f32.mrf.mxu0  ;;  %v1208_v3 = vadd.f32 %v924_v39, %v651_v62 }
 0x117   : > { %v1207_v2 = vadd.f32 %v904_v38, %v650_v61 }
 0x123   : > { %v1024_v36 = vpop.f32.mrf.mxu2  ;;  %v1044_v42 = vpop.f32.mrf.mxu3 }
 0x124   : > { %v1213_v8 = vadd.f32 %v1024_v36, %v656_v16  ;;  %v1214_v22 = vadd.f32 %v1044_v42, %v657_v17 }
 0x125   : > { %v984_v44 = vpop.f32.mrf.mxu0  ;;  %v1004_v45 = vpop.f32.mrf.mxu1 }
 0x126   : > { %v1211_v37 = vadd.f32 %v984_v44, %v654_v19  ;;  %v1212_v38 = vadd.f32 %v1004_v45, %v655_v20 }
 0x133   : > { %v2712_v40 = vpop.f32.mrf.mxu2  ;;  %v2719_v48 = vpop.f32.mrf.mxu3 }
 0x135   : > { %v2721_v49 = vpop.f32.mrf.mxu0  ;;  %v2723_v50 = vpop.f32.mrf.mxu1 }
 0x143   : > { %v1184_v46 = vpop.f32.mrf.mxu2  ;;  %v2727_v53 = vpop.f32.mrf.mxu3 }
 0x144   : > { %v2717_v47 = vadd.f32 %v1184_v46, %v664_v43 }
 0x145   : > { %v2732_v57 = vpop.f32.mrf.mxu0  ;;  %v2734_v58 = vpop.f32.mrf.mxu1 }
 0x153   : > { %v1433_v54 = vpop.f32.mrf.mxu2 }
 0x154   : > { %v1698_v56 = vadd.f32 %v1433_v54, %v1209_v52  ;;  %v660_v52 = vadd.f32 %v2714_v41, %v2692_v25  ;;  %v661_v54 = vadd.f32 %v2714_v41, %v2700_v30 }
 0x156   : > { %vm1715_vm4 = vcmp.gt.f32.partialorder %v1698_v56, 0.0  ;;  %v1732_v60 = vmul.f32 %v2730_v55, %v1698_v56  ;;  %v1218_v61 = vadd.f32 %v2719_v48, %v661_v54 }
 0x158   : > { %v1748_v63 = vsel %vm1715_vm4, %v1698_v56, %v1732_v60  ;;  %v658_v56 = vadd.f32 %v2714_v41, %v2702_v31  ;;  %v1217_v60 = vadd.f32 %v2712_v40, %v660_v52 }
 0x159   : > { %1764 = vst [vmem:[%s2740_s12 + $0x10] sm:$0xff] %v1748_v63 }
 0x15a   : > { %v1215_v25 = vadd.f32 %v2721_v49, %v658_v56 }
 0x15b   : > { %v1453_v1 = vpop.f32.mrf.mxu3 }
 0x15c   : > { %v1699_v4 = vadd.f32 %v1453_v1, %v1210_v0 }
 0x15d   : > { %v1393_v5 = vpop.f32.mrf.mxu0  ;;  %v1413_v6 = vpop.f32.mrf.mxu1 }
 0x15e   : > { %vm1716_vm5 = vcmp.gt.f32.partialorder %v1699_v4, 0.0  ;;  %v1733_v7 = vmul.f32 %v2730_v55, %v1699_v4  ;;  %v1696_v9 = vadd.f32 %v1393_v5, %v1207_v2  ;;  %v1697_v10 = vadd.f32 %v1413_v6, %v1208_v3 }
 0x15f   : > { %v1216_v2 = vadd.f32 %v2723_v50, %v659_v59 }
 0x160   : > { %v1749_v11 = vsel %vm1716_vm5, %v1699_v4, %v1733_v7  ;;  %vm1713_vm6 = vcmp.gt.f32.partialorder %v1696_v9, 0.0  ;;  %v1730_v12 = vmul.f32 %v2730_v55, %v1696_v9  ;;  %vm1714_vm7 = vcmp.gt.f32.partialorder %v1697_v10, 0.0 }
 0x161   : > { %1765 = vst [vmem:[%s2740_s12 + $0x18] sm:$0xff] %v1749_v11  ;;  %v1731_v13 = vmul.f32 %v2730_v55, %v1697_v10  ;;  %v665_v11 = vadd.f32 %v2714_v41, %v2706_v34 }
 0x162   : > { %v1746_v14 = vsel %vm1713_vm6, %v1696_v9, %v1730_v12  ;;  %v662_v9 = vadd.f32 %v2714_v41, %v2708_v21 }
 0x163   : > { %1762 = vst [vmem:[%s2740_s12] sm:$0xff] %v1746_v14  ;;  %v1747_v15 = vsel %vm1714_vm7, %v1697_v10, %v1731_v13  ;;  %v663_v10 = vadd.f32 %v2714_v41, %v2710_v35  ;;  %v1222_v14 = vadd.f32 %v2727_v53, %v665_v11 }
 0x164   : > { %1763 = vst [vmem:[%s2740_s12 + $0x8] sm:$0xff] %v1747_v15  ;;  %v1219_v12 = vadd.f32 %v2732_v57, %v662_v9 }
 0x165   : > { %v1220_v13 = vadd.f32 %v2734_v58, %v663_v10 }
 0x16b   : > { %v1513_v23 = vpop.f32.mrf.mxu2  ;;  %v1533_v24 = vpop.f32.mrf.mxu3 }
 0x16c   : > { %v1702_v29 = vadd.f32 %v1513_v23, %v1213_v8  ;;  %v1703_v33 = vadd.f32 %v1533_v24, %v1214_v22 }
 0x16d   : > { %v1473_v18 = vpop.f32.mrf.mxu0  ;;  %v1493_v39 = vpop.f32.mrf.mxu1 }
 0x16e   : > { %vm1719_vm8 = vcmp.gt.f32.partialorder %v1702_v29, 0.0  ;;  %v1736_v26 = vmul.f32 %v2730_v55, %v1702_v29  ;;  %vm1720_vm9 = vcmp.gt.f32.partialorder %v1703_v33, 0.0  ;;  %v1737_v27 = vmul.f32 %v2730_v55, %v1703_v33 }
 0x16f   : > { %v1700_v28 = vadd.f32 %v1473_v18, %v1211_v37  ;;  %v1701_v36 = vadd.f32 %v1493_v39, %v1212_v38 }
 0x170   : > { %v1752_v42 = vsel %vm1719_vm8, %v1702_v29, %v1736_v26  ;;  %v1753_v43 = vsel %vm1720_vm9, %v1703_v33, %v1737_v27 }
 0x171   : > { %1768 = vst [vmem:[%s2740_s12 + $0x30] sm:$0xff] %v1752_v42  ;;  %vm1717_vm10 = vcmp.gt.f32.partialorder %v1700_v28, 0.0  ;;  %v1734_v44 = vmul.f32 %v2730_v55, %v1700_v28  ;;  %vm1718_vm11 = vcmp.gt.f32.partialorder %v1701_v36, 0.0  ;;  %v1735_v45 = vmul.f32 %v2730_v55, %v1701_v36 }
 0x172   : > { %1769 = vst [vmem:[%s2740_s12 + $0x38] sm:$0xff] %v1753_v43 }
 0x173   : > { %v1750_v46 = vsel %vm1717_vm10, %v1700_v28, %v1734_v44  ;;  %v1751_v51 = vsel %vm1718_vm11, %v1701_v36, %v1735_v45 }
 0x174   : > { %1766 = vst [vmem:[%s2740_s12 + $0x20] sm:$0xff] %v1750_v46 }
 0x175   : > { %1767 = vst [vmem:[%s2740_s12 + $0x28] sm:$0xff] %v1751_v51 }
 0x17b   : > { %v1593_v62 = vpop.f32.mrf.mxu2  ;;  %v1613_v63 = vpop.f32.mrf.mxu3 }
 0x17c   : > { %v1706_v0 = vadd.f32 %v1593_v62, %v1217_v60  ;;  %v1707_v1 = vadd.f32 %v1613_v63, %v1218_v61 }
 0x17d   : > { %v1553_v30 = vpop.f32.mrf.mxu0  ;;  %v1573_v3 = vpop.f32.mrf.mxu1 }
 0x17e   : > { %vm1723_vm12 = vcmp.gt.f32.partialorder %v1706_v0, 0.0  ;;  %v1740_v31 = vmul.f32 %v2730_v55, %v1706_v0  ;;  %vm1724_vm13 = vcmp.gt.f32.partialorder %v1707_v1, 0.0  ;;  %v1741_v32 = vmul.f32 %v2730_v55, %v1707_v1 }
 0x17f   : > { %v1704_v40 = vadd.f32 %v1553_v30, %v1215_v25  ;;  %v1705_v48 = vadd.f32 %v1573_v3, %v1216_v2 }
 0x180   : > { %v1756_v4 = vsel %vm1723_vm12, %v1706_v0, %v1740_v31  ;;  %v1757_v5 = vsel %vm1724_vm13, %v1707_v1, %v1741_v32 }
 0x181   : > { %1772 = vst [vmem:[%s2740_s12 + $0x50] sm:$0xff] %v1756_v4  ;;  %vm1721_vm14 = vcmp.gt.f32.partialorder %v1704_v40, 0.0  ;;  %v1738_v49 = vmul.f32 %v2730_v55, %v1704_v40  ;;  %vm1722_vm15 = vcmp.gt.f32.partialorder %v1705_v48, 0.0  ;;  %v1739_v50 = vmul.f32 %v2730_v55, %v1705_v48 }
 0x182   : > { %1773 = vst [vmem:[%s2740_s12 + $0x58] sm:$0xff] %v1757_v5 }
 0x183   : > { %v1754_v6 = vsel %vm1721_vm14, %v1704_v40, %v1738_v49  ;;  %v1755_v7 = vsel %vm1722_vm15, %v1705_v48, %v1739_v50 }
 0x184   : > { %1770 = vst [vmem:[%s2740_s12 + $0x40] sm:$0xff] %v1754_v6 }
 0x185   : > { %1771 = vst [vmem:[%s2740_s12 + $0x48] sm:$0xff] %v1755_v7 }
 0x18b   : > { %v1633_v15 = vpop.f32.mrf.mxu0  ;;  %v1653_v16 = vpop.f32.mrf.mxu1 }
 0x18c   : > { %v1708_v17 = vadd.f32 %v1633_v15, %v1219_v12  ;;  %v1709_v19 = vadd.f32 %v1653_v16, %v1220_v13  ;;  %v1673_v20 = vpop.f32.mrf.mxu2  ;;  %v1693_v8 = vpop.f32.mrf.mxu3 }
 0x18d   : > { %v1710_v21 = vadd.f32 %v1673_v20, %v2717_v47  ;;  %v1711_v35 = vadd.f32 %v1693_v8, %v1222_v14 }
 0x18e   : > { %vm1725_vm0 = vcmp.gt.f32.partialorder %v1708_v17, 0.0  ;;  %v1742_v34 = vmul.f32 %v2730_v55, %v1708_v17  ;;  %vm1726_vm1 = vcmp.gt.f32.partialorder %v1709_v19, 0.0  ;;  %v1743_v41 = vmul.f32 %v2730_v55, %v1709_v19 }
 0x18f   : > { %vm1727_vm2 = vcmp.gt.f32.partialorder %v1710_v21, 0.0  ;;  %v1744_v53 = vmul.f32 %v2730_v55, %v1710_v21  ;;  %vm1728_vm3 = vcmp.gt.f32.partialorder %v1711_v35, 0.0  ;;  %v1745_v57 = vmul.f32 %v2730_v55, %v1711_v35 }
 0x190   : > { %v1758_v58 = vsel %vm1725_vm0, %v1708_v17, %v1742_v34  ;;  %v1759_v22 = vsel %vm1726_vm1, %v1709_v19, %v1743_v41 }
 0x191   : > { %1774 = vst [vmem:[%s2740_s12 + $0x60] sm:$0xff] %v1758_v58  ;;  %v1760_v23 = vsel %vm1727_vm2, %v1710_v21, %v1744_v53  ;;  %v1761_v47 = vsel %vm1728_vm3, %v1711_v35, %v1745_v57 }
 0x192   : > { %1775 = vst [vmem:[%s2740_s12 + $0x68] sm:$0xff] %v1759_v22 }
 0x193   : > { %1776 = vst [vmem:[%s2740_s12 + $0x70] sm:$0xff] %v1760_v23 }
 0x194   : > { %1777 = vst [vmem:[%s2740_s12 + $0x78] sm:$0xff] %v1761_v47 }
 0x195 PF: > { %s15_s19 = sadd.s32 1, %s2104_s19   ;;  %s2820_s17 = smov %s2100_s18 }
 0x196   : > { %p12_p5 = scmp.ge.s32.totalorder %s15_s19, 4   ;;  %s2821_s18 = smov %s2823_s3 }
 0x198   :  { %14 = sbr.rel (!%p12_p5) target bundleno = 2 (0x2), region = 66 }

</bundles_post_ra>
